<compile_context>
chip_gen: v5e
topology: v5e:2x2
jax: 0.10.0
libtpu: 0.0.40
codegen_flags: <defaults>
</compile_context>

<pallas_src>
import jax
import jax.numpy as jnp
from jax.experimental import pallas as pl
from jax.experimental.pallas import tpu as pltpu


# Tokens gathered per grid step on the HBM per-row-DMA path.  Multiple of 32
# so f32 / bf16 / int8 tables all stay sublane-tile aligned.
GATHER_TOKENS_PER_STEP = 128
# Tokens per grid step on the VMEM-resident one-hot/MXU fast path.
ONEHOT_TOKENS_PER_STEP = 256
# Tables at or below this size take the VMEM fast path (conservative so the
# (possibly double-buffered) table + output blocks fit every generation,
# including v7x's 64 MiB physical / 32 MiB default-scoped VMEM).
VMEM_TABLE_BUDGET_BYTES = 8 * 1024 * 1024


def _round_up(x, m):
    return ((x + m - 1) // m) * m


def _embed_gather_hbm_kernel(idx_ref, table_ref, out_ref, sem):
    """Gather T rows of the HBM table straight into this step's output block.

    idx_ref:   SMEM (n_padded,) int32  -- scalar-prefetched token ids
    table_ref: HBM  (vocab, embed_dim) -- raw ref, manual DMA
    out_ref:   VMEM (T, embed_dim)     -- auto-pipelined output block (DMA dst)
    sem:       shared DMA semaphore    -- all copies are the same size
    """
    step = pl.program_id(0)
    t_per_step = out_ref.shape[0]
    base = step * t_per_step

    # Issue all row DMAs for this block (HBM -> out_ref), keeping the start
    # descriptors so we can wait on exactly the copies we started.
    copies = []
    for t in range(t_per_step):  # static unroll, T is a compile-time constant
        row = idx_ref[base + t]
        cp = pltpu.make_async_copy(
            table_ref.at[pl.ds(row, 1), :],
            out_ref.at[pl.ds(t, 1), :],
            sem,
        )
        cp.start()
        copies.append(cp)

    # Wait for all T completions (identical sizes on one shared semaphore, so
    # T waits account for exactly the T row copies).  Pallas writes the output
    # block back to HBM only after the body finishes, so no extra store needed.
    for cp in copies:
        cp.wait()


def _embed_onehot_kernel(idx_ref, table_ref, out_ref):
    """VMEM fast path: one_hot(ids, vocab) @ table on the MXU.

    idx_ref:   VMEM (T, 1) int32       -- this step's token ids
    table_ref: VMEM (vocab, embed_dim) -- full table, resident across steps
    out_ref:   VMEM (T, embed_dim)
    """
    t_per_step = out_ref.shape[0]
    vocab = table_ref.shape[0]

    ids = idx_ref[...]                                             # (T, 1)
    lane_ids = jax.lax.broadcasted_iota(jnp.int32, (t_per_step, vocab), 1)
    onehot = (ids == lane_ids).astype(table_ref.dtype)             # (T, vocab)
    out_ref[...] = jnp.dot(
        onehot, table_ref[...], preferred_element_type=jnp.float32
    ).astype(out_ref.dtype)


def patch_embed_forward(seq, node2vec, *, force_hbm_gather=False):
    """Pallas equivalent of nn.Embedding.from_pretrained(node2vec)(seq).

    seq:      integer array of any shape (...,)
    node2vec: (vocab, embed_dim) embedding table
    returns:  (..., embed_dim) gathered embeddings, dtype of node2vec
    """
    vocab, embed_dim = node2vec.shape
    orig_shape = seq.shape

    idx = seq.reshape(-1).astype(jnp.int32)
    n_tokens = idx.shape[0]
    if n_tokens == 0:  # empty sequence: nothing to gather
        return jnp.zeros((*orig_shape, embed_dim), node2vec.dtype)

    itemsize = jnp.dtype(node2vec.dtype).itemsize
    # Keep blocks aligned to the packed sublane tile: 8 (f32), 16 (bf16), 32 (i8).
    sub_mult = max(8, 32 // itemsize)

    table_bytes = vocab * embed_dim * itemsize
    use_vmem_table = (table_bytes <= VMEM_TABLE_BUDGET_BYTES) and not force_hbm_gather

    t_target = ONEHOT_TOKENS_PER_STEP if use_vmem_table else GATHER_TOKENS_PER_STEP
    t_per_step = min(t_target, _round_up(n_tokens, sub_mult))
    n_steps = pl.cdiv(n_tokens, t_per_step)
    n_padded = n_steps * t_per_step
    if n_padded != n_tokens:
        # Pad with row 0; padded rows are sliced off below.
        idx = jnp.concatenate(
            [idx, jnp.zeros((n_padded - n_tokens,), jnp.int32)], axis=0)

    cost = pl.CostEstimate(
        flops=(2 * n_padded * vocab * embed_dim) if use_vmem_table else 0,
        transcendentals=0,
        bytes_accessed=(2 * n_padded * embed_dim * itemsize + n_padded * 4
                        + (table_bytes if use_vmem_table else 0)),
    )

    if use_vmem_table:
        idx2d = idx.reshape(n_padded, 1)
        out = pl.pallas_call(
            _embed_onehot_kernel,
            out_shape=jax.ShapeDtypeStruct((n_padded, embed_dim), node2vec.dtype),
            grid_spec=pltpu.PrefetchScalarGridSpec(
                num_scalar_prefetch=0,
                grid=(n_steps,),
                in_specs=[
                    pl.BlockSpec((t_per_step, 1), lambda i: (i, 0)),
                    # Full table, constant block index -> loaded once, resident.
                    pl.BlockSpec((vocab, embed_dim), lambda i: (0, 0)),
                ],
                out_specs=pl.BlockSpec((t_per_step, embed_dim),
                                       lambda i: (i, 0)),
            ),
            compiler_params=pltpu.CompilerParams(
                dimension_semantics=("parallel",)),   # v7x: shard across 2 TCs
            cost_estimate=cost,
        )(idx2d, node2vec)
    else:
        out = pl.pallas_call(
            _embed_gather_hbm_kernel,
            out_shape=jax.ShapeDtypeStruct((n_padded, embed_dim), node2vec.dtype),
            grid_spec=pltpu.PrefetchScalarGridSpec(
                num_scalar_prefetch=1,               # idx -> SMEM
                grid=(n_steps,),
                in_specs=[
                    pl.BlockSpec(memory_space=pl.ANY),   # table stays in HBM
                ],
                out_specs=pl.BlockSpec(
                    (t_per_step, embed_dim), lambda i, idx_ref: (i, 0)),
                scratch_shapes=[
                    pltpu.SemaphoreType.DMA(()),         # one shared DMA sem
                ],
            ),
            compiler_params=pltpu.CompilerParams(
                dimension_semantics=("parallel",)),
            cost_estimate=cost,
        )(idx, node2vec)

    return out[:n_tokens].reshape(*orig_shape, embed_dim)


if __name__ == "__main__":
    key = jax.random.PRNGKey(0)
    k_tab, k_seq = jax.random.split(key, 2)

    # Small shapes consistent with the module (a node2vec table + token ids).
    # embed_dim kept a multiple of 128 for lane-dense stores (module default 768).
    vocab, embed_dim = 64, 256
    batch, seq_len = 2, 8

    node2vec = jax.random.normal(k_tab, (vocab, embed_dim), dtype=jnp.float32)
    seq = jax.random.randint(k_seq, (batch, seq_len), 0, vocab, dtype=jnp.int32)

    ref = node2vec[seq]  # reference: plain JAX embedding lookup

    # Path 1: VMEM-resident one-hot/MXU fast path (default for this table size).
    out_fast = jax.block_until_ready(patch_embed_forward(seq, node2vec))
    assert out_fast.shape == (batch, seq_len, embed_dim)
    assert jnp.allclose(out_fast, ref), "fast-path mismatch vs reference lookup"

    # Path 2: HBM per-row-DMA gather (what large vocabularies take), forced for
    # coverage on the same small input.
    out_gather = jax.block_until_ready(
        patch_embed_forward(seq, node2vec, force_hbm_gather=True))
    assert jnp.allclose(out_gather, ref), "gather-path mismatch vs reference"

    # Uneven token count -> padding + multiple grid steps on the gather path.
    seq2 = jax.random.randint(jax.random.PRNGKey(1), (3, 50), 0, vocab,
                              dtype=jnp.int32)
    out2 = jax.block_until_ready(
        patch_embed_forward(seq2, node2vec, force_hbm_gather=True))
    assert jnp.allclose(out2, node2vec[seq2]), "multi-step gather mismatch"

    print("KERNEL_OK")
</pallas_src>

<mosaic_0001>
module attributes {stable_mosaic.version = 11 : i64} {
  func.func @_embed_onehot_kernel(%arg0: i32, %arg1: memref<16x1xi32, #tpu.memory_space<vmem>>, %arg2: memref<64x256xf32, #tpu.memory_space<vmem>>, %arg3: memref<16x256xf32, #tpu.memory_space<vmem>>) attributes {dimension_semantics = [#tpu.dimension_semantics<parallel>], iteration_bounds = array<i64: 1>, scalar_prefetch = 0 : i64, scratch_operands = 0 : i64, tpu.core_type = #tpu.core_type<tc>, window_params = [{transform_indices = @transform_0, window_bounds = array<i64: 16, 1>}, {pipeline_mode = #tpu.pipeline_mode<synchronous>, transform_indices = @transform_1, window_bounds = array<i64: 64, 256>}, {transform_indices = @transform_2, window_bounds = array<i64: 16, 256>}]} {
    %c0 = arith.constant 0 : index
    %c0_0 = arith.constant 0 : index
    %0 = vector.load %arg1[%c0, %c0_0] : memref<16x1xi32, #tpu.memory_space<vmem>>, vector<16x1xi32>
    %1 = tpu.iota {dimensions = array<i32: 1>} : vector<16x64xi32>
    %2 = vector.broadcast %0 : vector<16x1xi32> to vector<16x64xi32>
    %3 = arith.cmpi eq, %2, %1 : vector<16x64xi32>
    %4 = arith.extui %3 : vector<16x64xi1> to vector<16x64xi32>
    %5 = arith.sitofp %4 : vector<16x64xi32> to vector<16x64xf32>
    %c0_1 = arith.constant 0 : index
    %c0_2 = arith.constant 0 : index
    %6 = vector.load %arg2[%c0_1, %c0_2] : memref<64x256xf32, #tpu.memory_space<vmem>>, vector<64x256xf32>
    %cst = arith.constant dense<0.000000e+00> : vector<16x256xf32>
    %7 = tpu.matmul %5, %6, %cst {dimension_numbers = #tpu.dot_dimension_numbers<[1], [0], [0], [1], [0, 0, 1, 1], [], []>} : vector<16x64xf32>, vector<64x256xf32>, vector<16x256xf32> -> vector<16x256xf32>
    %c0_3 = arith.constant 0 : index
    %c0_4 = arith.constant 0 : index
    %8 = vector.load %arg3[%c0_3, %c0_4] : memref<16x256xf32, #tpu.memory_space<vmem>>, vector<16x256xf32>
    tpu.vector_store %arg3[%c0_3, %c0_4], %7 {strides = array<i32>} : memref<16x256xf32, #tpu.memory_space<vmem>>, vector<16x256xf32>,
    return
  }
  func.func @transform_0(%arg0: i32) -> (i32, i32) {
    %c0_i32 = arith.constant 0 : i32
    %c0_i32_0 = arith.constant 0 : i32
    return %arg0, %c0_i32 : i32, i32
  }
  func.func @transform_1(%arg0: i32) -> (i32, i32) {
    %c0_i32 = arith.constant 0 : i32
    %c0_i32_0 = arith.constant 0 : i32
    %c0_i32_1 = arith.constant 0 : i32
    return %c0_i32, %c0_i32_0 : i32, i32
  }
  func.func @transform_2(%arg0: i32) -> (i32, i32) {
    %c0_i32 = arith.constant 0 : i32
    %c0_i32_0 = arith.constant 0 : i32
    return %arg0, %c0_i32 : i32, i32
  }
}

</mosaic_0001>

<bundles_post_ra>
// kernel: tpu_custom_call.1
= control target key start
LH: loop header
LB: loop body
LE: loop exit
PB: predicated region body
PF: predicated region fallthrough
CT: control target
= control target key end

     0   :  { %7 = vsyncpa [#allocation3], 0  ;;  %s256_s0 = inlined_call_operand.vmem [shape: s32[16,1], index: 0, kind: input, shape index: {}]   ;;  %s257_s1 = inlined_call_operand.hbm [shape: f32[64,256], index: 1, kind: input, shape index: {}]   ;;  %s258_s2 = inlined_call_operand.hbm [shape: f32[16,256], index: 2, kind: output, shape index: {}]  }
   0x1   :  { %8 = vsyncpa [#allocation4], 0  ;;  %s15_s11 = sshll.u32 %s257_s1, 4  ;;  %s217_s12 = smov [#allocation2]   ;;  %s16_s11 = int_to_ptr.hbm [resolvable:$true] %s15_s11 }
   0x2   :  { %s17_s13 = sshll.u32 %s217_s12, 4  ;;  %s218_s14 = smov 256   ;;  %s18_s13 = int_to_ptr.vmem [resolvable:$true] %s17_s13 }
   0x3   :  { %s219_s15 = smov 16  }
   0x4   :  { %23 = dma.hbm_to_vmem [thread:$0]  %s16_s11, 2048, %s18_s13, [#allocation3], %s218_s14, %s218_s14, %s219_s15  }
   0x5   :  { %213 = dma.done.wait [#allocation3], 2048  }
   0x6   :  { %214 = vsyncadd [#allocation3], 4294965248  ;;  %v220_v0 = vmov 0   ;;  %v29_v1 = vld [vmem:[%s256_s0 + $0x8] sm:$0xff]  ;;  %v58_v2 = vld [vmem:[#allocation2 + $0x70] sm:$0xff]  ;;  %v30_v19 = vlaneseq  ;;  %vm60_vm0 = vcmask 523264  }
   0x7   :  { %164 = vset.pattern.permute.xlu0 %v220_v0  ;;  %142 = vmatpush.msra.mxu2 %v58_v2  ;;  %v59_v3 = vld [vmem:[#allocation2 + $0x78] sm:$0xff]  ;;  %v56_v4 = vld [vmem:[#allocation2 + $0x60] sm:$0xff]  ;;  %v57_v5 = vld [vmem:[#allocation2 + $0x68] sm:$0xff]  ;;  %v221_v22 = vmov 0.0   ;;  %s123_s22 = sshll.u32 %s258_s2, 4  ;;  %s124_s22 = int_to_ptr.hbm [resolvable:$true] %s123_s22 }
   0x8   :  { %36 = vperm.xlu0 %164, %v29_v1   ;;  %150 = vmatpush.msra.mxu3 %v59_v3  ;;  %v54_v6 = vld [vmem:[#allocation2 + $0x50] sm:$0xff]  ;;  %v55_v7 = vld [vmem:[#allocation2 + $0x58] sm:$0xff]  ;;  %v52_v8 = vld [vmem:[#allocation2 + $0x40] sm:$0xff]  ;;  %v31_v20 = vand.u32 127, %v30_v19 }
   0x9   :  { %75 = vmatpush.msra.mxu0 %v58_v2  ;;  %143 = vmatpush.msra.mxu2 %v56_v4  ;;  %v53_v9 = vld [vmem:[#allocation2 + $0x48] sm:$0xff]  ;;  %v28_v10 = vld [vmem:[%s256_s0] sm:$0xff]  ;;  %v50_v11 = vld [vmem:[#allocation2 + $0x30] sm:$0xff]  ;;  %s222_s0 = smov [#allocation5]  }
   0xa   :  { %98 = vmatpush.msra.mxu1 %v59_v3  ;;  %151 = vmatpush.msra.mxu3 %v57_v5  ;;  %v51_v12 = vld [vmem:[#allocation2 + $0x38] sm:$0xff]  ;;  %v48_v13 = vld [vmem:[#allocation2 + $0x20] sm:$0xff]  ;;  %v49_v14 = vld [vmem:[#allocation2 + $0x28] sm:$0xff]  ;;  %s121_s19 = sshll.u32 %s222_s0, 4  ;;  %s122_s19 = int_to_ptr.vmem [resolvable:$true] %s121_s19 }
   0xb   :  { %76 = vmatpush.msra.mxu0 %v56_v4  ;;  %144 = vmatpush.msra.mxu2 %v54_v6  ;;  %v46_v15 = vld [vmem:[#allocation2 + $0x10] sm:$0xff]  ;;  %v47_v16 = vld [vmem:[#allocation2 + $0x18] sm:$0xff]  ;;  %v44_v17 = vld [vmem:[#allocation2] sm:$0xff] }
   0xc   :  { %99 = vmatpush.msra.mxu1 %v57_v5  ;;  %152 = vmatpush.msra.mxu3 %v55_v7  ;;  %v45_v18 = vld [vmem:[#allocation2 + $0x8] sm:$0xff] }
   0xd   :  { %77 = vmatpush.msra.mxu0 %v54_v6  ;;  %145 = vmatpush.msra.mxu2 %v52_v8 }
   0xe   :  { %100 = vmatpush.msra.mxu1 %v55_v7  ;;  %153 = vmatpush.msra.mxu3 %v53_v9 }
   0xf   :  { %78 = vmatpush.msra.mxu0 %v52_v8  ;;  %146 = vmatpush.msra.mxu2 %v50_v11 }
  0x10   :  { %33 = vperm.xlu0 %164, %v28_v10   ;;  %154 = vmatpush.msra.mxu3 %v51_v12 }
  0x11   :  { %101 = vmatpush.msra.mxu1 %v53_v9  ;;  %147 = vmatpush.msra.mxu2 %v48_v13 }
  0x12   :  { %79 = vmatpush.msra.mxu0 %v50_v11  ;;  %155 = vmatpush.msra.mxu3 %v49_v14 }
  0x13   :  { %102 = vmatpush.msra.mxu1 %v51_v12  ;;  %148 = vmatpush.msra.mxu2 %v46_v15 }
  0x14   :  { %80 = vmatpush.msra.mxu0 %v48_v13  ;;  %156 = vmatpush.msra.mxu3 %v47_v16 }
  0x15   :  { %103 = vmatpush.msra.mxu1 %v49_v14  ;;  %149 = vmatpush.msra.mxu2 %v44_v17 }
  0x16   :  { %81 = vmatpush.msra.mxu0 %v46_v15  ;;  %157 = vmatpush.msra.mxu3 %v45_v18 }
  0x17   :  { %104 = vmatpush.msra.mxu1 %v47_v16 }
  0x18   :  { %82 = vmatpush.msra.mxu0 %v44_v17 }
  0x19   :  { %105 = vmatpush.msra.mxu1 %v45_v18 }
  0x7a   :  { %v37_v21 = vpop.permute.xlu0 %36 }
  0x7b   :  { %vm39_vm1 = vcmp.eq.s32.totalorder %v37_v21, %v31_v20 }
  0x7c   :  { %v137_v23 = vsel %vm39_vm1, 1.0, %v221_v22 }
  0x7d   :  { %139 = vmatmul.msk.f32.vlgmr.msra.gmra.mxu2 %vm60_vm0, %v137_v23  ;;  %141 = vmatmul.msk.f32.vlgmr.msra.gmra.mxu3 %vm60_vm0, %v137_v23 }
  0x82   :  { %v34_v24 = vpop.permute.xlu0 %33 }
  0x83   :  { %vm38_vm2 = vcmp.eq.s32.totalorder %v34_v24, %v31_v20 }
  0x84   :  { %v136_v25 = vsel %vm38_vm2, 1.0, %v221_v22 }
  0x85   :  { %138 = vmatmul.msk.f32.vlgmr.msra.gmra.mxu0 %vm60_vm0, %v136_v25  ;;  %140 = vmatmul.msk.f32.vlgmr.msra.gmra.mxu1 %vm60_vm0, %v136_v25 }
 0x100   :  { %v87_v26 = vpop.f32.mrf.mxu2  ;;  %v110_v27 = vpop.f32.mrf.mxu3 }
 0x101   :  { %115 = vst [vmem:[#allocation5 + $0x10] sm:$0xff] %v87_v26 }
 0x102   :  { %116 = vst [vmem:[#allocation5 + $0x18] sm:$0xff] %v110_v27  ;;  %v84_v28 = vpop.f32.mrf.mxu0  ;;  %v107_v29 = vpop.f32.mrf.mxu1 }
 0x103   :  { %113 = vst [vmem:[#allocation5] sm:$0xff] %v84_v28 }
 0x104   :  { %114 = vst [vmem:[#allocation5 + $0x8] sm:$0xff] %v107_v29 }
 0x105   :  { %129 = dma.vmem_to_hbm [thread:$0]  %s122_s19, 512, %s124_s22, [#allocation4], %s218_s14, %s218_s14, %s219_s15  }
 0x106   :  { %215 = dma.done.wait [#allocation4], 512  }
 0x107   :  { %216 = vsyncadd [#allocation4], 4294966784 }
 0x108   :  { %134 = vsyncpa [#allocation3], 1 }
 0x109   :  { %135 = vsyncpa [#allocation4], 1 }

</bundles_post_ra>
